<compile_context>
chip_gen: v6e
topology: v6e:2x2x1
jax: 0.10.0
libtpu: 0.0.40
codegen_flags: <defaults>
</compile_context>

<pallas_src>
import functools

import jax
import jax.numpy as jnp
from jax.experimental import pallas as pl
from jax.experimental.pallas import tpu as pltpu

EPS = 1e-5

_VMEM_SPEC = pl.BlockSpec(memory_space=pltpu.MemorySpace.VMEM)


def _bn(acc, gamma, beta, inv_cnt):
    """Training-mode BatchNorm (biased variance) on a (C, P) slab."""
    m = jnp.sum(acc, axis=1, keepdims=True) * inv_cnt
    c = acc - m                                    # centered once, reused
    v = jnp.sum(c * c, axis=1, keepdims=True) * inv_cnt
    return c * (gamma * jax.lax.rsqrt(v + EPS)) + beta


def _shifted_taps(src, w):
    """9 spatial taps of a 3x3 window on a channel-major (C, N*H*W) slab.

    out[t][:, p] = src[:, p + dy*W + dx], zero-filled past the slab ends.
    Row-crossing / sample-crossing positions are invalid and get zeroed later
    by the precomputed border masks, so only valid positions matter here.
    Static slice + concat keeps the shift semantics unambiguous on both the
    compiled Mosaic path and interpret mode (no pltpu.roll direction probe).
    """
    c, _ = src.shape
    taps = []
    for t in range(9):
        dy, dx = t // 3 - 1, t % 3 - 1
        s = dy * w + dx
        if s == 0:
            taps.append(src)
        elif s > 0:
            taps.append(jnp.concatenate(
                [src[:, s:], jnp.zeros((c, s), src.dtype)], axis=1))
        else:
            taps.append(jnp.concatenate(
                [jnp.zeros((c, -s), src.dtype), src[:, :s]], axis=1))
    return taps


def conv_block_kernel(W,
                      m1_ref, m2_ref, x_ref,
                      w1s_ref, g1_ref, be1_ref,
                      w2_ref, g2_ref, be2_ref,
                      bs_ref,
                      out_ref,
                      p2_ref):
    """Fused conv_block forward (channel-major, lane-dense activations).

    m1_ref  : (9*Cin,  P)    conv1 border masks, pre-broadcast over channels
    m2_ref  : (9*Cout, P)    conv2 border masks, pre-broadcast over channels
    x_ref   : (N, Cin, H*W)  input (free row-major reshape of NCHW)
    w1s_ref : (2*Cout, 9*Cin) conv1 im2col weights stacked on 1x1 skip weights
    w2_ref  : (Cout, 9*Cout) conv2 im2col weights
    g*/be*/bs : (Cout, 1)    BN gamma/beta, skip bias
    out_ref : (N, Cout, H*W) NCHW-ordered output
    p2_ref  : (9*Cout, P)    scratch: conv2 im2col patch
    """
    N, Cin, HW = x_ref.shape
    Cout = out_ref.shape[1]
    P = N * HW
    inv_cnt = 1.0 / P

    # Gather the batch into one lane-dense (Cin, N*H*W) slab; per-sample
    # slices are lane-aligned (HW is a multiple of 128 at these shapes).
    xf = jnp.concatenate([x_ref[n] for n in range(N)], axis=1)

    # conv1 (3x3, pad 1) fused with the 1x1 skip conv: a single MXU matmul.
    # Rows [0, Cout) of w1s are the conv1 im2col weights; rows [Cout, 2*Cout)
    # hold the skip weights placed in the centre-tap columns (zeros elsewhere),
    # so acc[Cout:] is exactly the 1x1 skip conv of the raw input.
    # Conv biases are omitted: exactly cancelled by training-mode BN.
    patch1 = jnp.concatenate(_shifted_taps(xf, W), axis=0) * m1_ref[...]
    acc = jnp.dot(w1s_ref[...], patch1, preferred_element_type=jnp.float32)
    h1 = jnp.maximum(_bn(acc[:Cout, :], g1_ref[...], be1_ref[...], inv_cnt), 0.0)
    skip = acc[Cout:, :] + bs_ref[...]

    # conv2 (3x3, pad 1) -> BN2 (bias again cancelled by BN).  The patch goes
    # through VMEM scratch; every per-tap store / mask read is a full aligned
    # 8-sublane slice (Cout == 8).
    taps2 = _shifted_taps(h1, W)
    for t in range(9):
        sl = slice(t * Cout, (t + 1) * Cout)
        p2_ref[sl, :] = taps2[t] * m2_ref[sl, :]
    acc2 = jnp.dot(w2_ref[...], p2_ref[...], preferred_element_type=jnp.float32)
    h2 = _bn(acc2, g2_ref[...], be2_ref[...], inv_cnt)

    # Residual add + final ReLU; store per-sample lane-aligned slices straight
    # into NCHW order (wrapper only does a free reshape).
    y = jnp.maximum(h2 + skip, 0.0)
    for n in range(N):
        out_ref[n] = y[:, n * HW:(n + 1) * HW]


def conv_block_forward(x_nchw, params):
    """Wrapper: NCHW in, NCHW out (matches the PyTorch module interface)."""
    N, Cin, H, W = x_nchw.shape
    Cout = params["w1"].shape[-1]
    HW, P = H * W, N * H * W

    x3 = x_nchw.reshape(N, Cin, HW).astype(jnp.float32)        # free reshape

    # im2col weight matrices: column index = (ky*3 + kx)*C + c   (HWIO source)
    w1m = jnp.transpose(params["w1"], (3, 0, 1, 2)).reshape(Cout, 9 * Cin)
    w2m = jnp.transpose(params["w2"], (3, 0, 1, 2)).reshape(Cout, 9 * Cout)
    wsm = jnp.transpose(params["wskip"]).astype(jnp.float32)   # (Cout, Cin)
    # Fuse the 1x1 skip conv into conv1: its weights occupy the centre-tap
    # (t == 4) columns of Cout extra output rows.
    w_skip_rows = jnp.zeros((Cout, 9 * Cin), jnp.float32)
    w_skip_rows = w_skip_rows.at[:, 4 * Cin:5 * Cin].set(wsm)
    w1s = jnp.concatenate([w1m.astype(jnp.float32), w_skip_rows], axis=0)

    bs = params["bskip"].reshape(Cout, 1)
    g1 = params["g1"].reshape(Cout, 1)
    be1 = params["be1"].reshape(Cout, 1)
    g2 = params["g2"].reshape(Cout, 1)
    be2 = params["be2"].reshape(Cout, 1)

    # Border-validity masks for the 9 taps (zero padding handled in-kernel),
    # pre-broadcast over channels so masking is one aligned full-slab multiply.
    p = jnp.arange(P)
    hh = (p % HW) // W
    ww = p % W
    rows = []
    for ky in range(3):
        for kx in range(3):
            dy, dx = ky - 1, kx - 1
            rows.append((hh + dy >= 0) & (hh + dy < H)
                        & (ww + dx >= 0) & (ww + dx < W))
    m9 = jnp.stack(rows).astype(jnp.float32)                    # (9, P)
    m1 = jnp.repeat(m9, Cin, axis=0)                            # (9*Cin, P)
    m2 = jnp.repeat(m9, Cout, axis=0)                           # (9*Cout, P)

    kernel = functools.partial(conv_block_kernel, W)
    out3 = pl.pallas_call(
        kernel,
        out_shape=jax.ShapeDtypeStruct((N, Cout, HW), jnp.float32),
        in_specs=[_VMEM_SPEC] * 10,
        out_specs=_VMEM_SPEC,
        scratch_shapes=[pltpu.VMEM((9 * Cout, P), jnp.float32)],
    )(m1, m2, x3, w1s, g1, be1, w2m, g2, be2, bs)

    return out3.reshape(N, Cout, H, W)                          # free reshape


def init_params(key, in_c, out_c):
    """Deterministic synthetic parameters (PyTorch-style conv init shapes)."""
    ks = jax.random.split(key, 10)

    def conv_init(kw, kb, cin, cout, ksz):
        fan_in = cin * ksz * ksz
        bound = 1.0 / float(fan_in) ** 0.5
        w = jax.random.uniform(kw, (ksz, ksz, cin, cout), jnp.float32, -bound, bound)
        b = jax.random.uniform(kb, (1, cout), jnp.float32, -bound, bound)
        return w, b

    w1, b1 = conv_init(ks[0], ks[1], in_c, out_c, 3)
    w2, b2 = conv_init(ks[2], ks[3], out_c, out_c, 3)
    wskip4, bskip = conv_init(ks[4], ks[5], in_c, out_c, 1)
    g1 = 1.0 + 0.1 * jax.random.normal(ks[6], (1, out_c), jnp.float32)
    g2 = 1.0 + 0.1 * jax.random.normal(ks[7], (1, out_c), jnp.float32)
    be1 = 0.1 * jax.random.normal(ks[8], (1, out_c), jnp.float32)
    be2 = 0.1 * jax.random.normal(ks[9], (1, out_c), jnp.float32)
    return dict(
        w1=w1, b1=b1, g1=g1, be1=be1,
        w2=w2, b2=b2, g2=g2, be2=be2,
        wskip=wskip4[0, 0], bskip=bskip,
    )


def reference_forward(x_nchw, params):
    """Pure-JAX reference replicating the PyTorch forward (training-mode BN,
    conv biases included - the kernel drops b1/b2 because BN cancels them)."""
    x = jnp.transpose(x_nchw, (0, 2, 3, 1)).astype(jnp.float32)

    def conv(h, w, b):
        y = jax.lax.conv_general_dilated(
            h, w, (1, 1), "SAME",
            dimension_numbers=("NHWC", "HWIO", "NHWC"))
        return y + b.reshape(1, 1, 1, -1)

    def bn(h, g, be):
        m = jnp.mean(h, axis=(0, 1, 2), keepdims=True)
        v = jnp.mean((h - m) ** 2, axis=(0, 1, 2), keepdims=True)
        return (h - m) * jax.lax.rsqrt(v + EPS) * g.reshape(1, 1, 1, -1) \
            + be.reshape(1, 1, 1, -1)

    h = jnp.maximum(bn(conv(x, params["w1"], params["b1"]),
                       params["g1"], params["be1"]), 0.0)
    h = bn(conv(h, params["w2"], params["b2"]), params["g2"], params["be2"])
    skip = jnp.einsum("nhwi,io->nhwo", x, params["wskip"]) \
        + params["bskip"].reshape(1, 1, 1, -1)
    out = jnp.maximum(h + skip, 0.0)
    return jnp.transpose(out, (0, 3, 1, 2))


if __name__ == "__main__":
    key = jax.random.PRNGKey(0)
    k_x, k_p = jax.random.split(key)

    N, in_c, out_c, H, W = 2, 4, 8, 16, 16
    x = jax.random.normal(k_x, (N, in_c, H, W), jnp.float32)
    params = init_params(k_p, in_c, out_c)

    fwd = jax.jit(conv_block_forward)
    out = jax.block_until_ready(fwd(x, params))
    ref = jax.block_until_ready(reference_forward(x, params))

    assert out.shape == (N, out_c, H, W)
    err = float(jnp.max(jnp.abs(out - ref)))
    # Tolerance covers MXU default-precision effects: the XLA reference conv
    # and the in-kernel matmuls may round f32 operands to bf16 on different
    # paths; genuine layout/mask/shift bugs show up as O(0.1 - 1) errors.
    assert jnp.allclose(out, ref, rtol=2e-2, atol=2e-2), f"max abs err {err}"

    print("KERNEL_OK")
</pallas_src>

<mosaic_0001>
module attributes {stable_mosaic.version = 11 : i64} {
  func.func @conv_block_kernel(%arg0: memref<36x512xf32, #tpu.memory_space<vmem>>, %arg1: memref<72x512xf32, #tpu.memory_space<vmem>>, %arg2: memref<2x4x256xf32, #tpu.memory_space<vmem>>, %arg3: memref<16x36xf32, #tpu.memory_space<vmem>>, %arg4: memref<8x1xf32, #tpu.memory_space<vmem>>, %arg5: memref<8x1xf32, #tpu.memory_space<vmem>>, %arg6: memref<8x72xf32, #tpu.memory_space<vmem>>, %arg7: memref<8x1xf32, #tpu.memory_space<vmem>>, %arg8: memref<8x1xf32, #tpu.memory_space<vmem>>, %arg9: memref<8x1xf32, #tpu.memory_space<vmem>>, %arg10: memref<2x8x256xf32, #tpu.memory_space<vmem>>, %arg11: memref<72x512xf32, #tpu.memory_space<vmem>>) attributes {dimension_semantics = [], scalar_prefetch = 0 : i64, scratch_operands = 1 : i64, tpu.core_type = #tpu.core_type<tc>} {
    %c0 = arith.constant 0 : index
    %c0_0 = arith.constant 0 : index
    %c0_1 = arith.constant 0 : index
    %0 = vector.load %arg2[%c0, %c0_0, %c0_1] : memref<2x4x256xf32, #tpu.memory_space<vmem>>, vector<1x4x256xf32>
    %1 = vector.shape_cast %0 : vector<1x4x256xf32> to vector<4x256xf32>
    %c1 = arith.constant 1 : index
    %c0_2 = arith.constant 0 : index
    %c0_3 = arith.constant 0 : index
    %2 = vector.load %arg2[%c1, %c0_2, %c0_3] : memref<2x4x256xf32, #tpu.memory_space<vmem>>, vector<1x4x256xf32>
    %3 = vector.shape_cast %2 : vector<1x4x256xf32> to vector<4x256xf32>
    %4 = tpu.concatenate %1, %3 in 1 : vector<4x256xf32>, vector<4x256xf32> -> vector<4x512xf32>
    %cst = arith.constant 0.000000e+00 : f32
    %5 = vector.broadcast %cst : f32 to vector<4x17xf32>
    %6 = vector.extract_strided_slice %4 {offsets = [0, 0], sizes = [4, 495], strides = [1, 1]} : vector<4x512xf32> to vector<4x495xf32>
    %7 = tpu.concatenate %5, %6 in 1 : vector<4x17xf32>, vector<4x495xf32> -> vector<4x512xf32>
    %cst_4 = arith.constant 0.000000e+00 : f32
    %8 = vector.broadcast %cst_4 : f32 to vector<4x16xf32>
    %9 = vector.extract_strided_slice %4 {offsets = [0, 0], sizes = [4, 496], strides = [1, 1]} : vector<4x512xf32> to vector<4x496xf32>
    %10 = tpu.concatenate %8, %9 in 1 : vector<4x16xf32>, vector<4x496xf32> -> vector<4x512xf32>
    %cst_5 = arith.constant 0.000000e+00 : f32
    %11 = vector.broadcast %cst_5 : f32 to vector<4x15xf32>
    %12 = vector.extract_strided_slice %4 {offsets = [0, 0], sizes = [4, 497], strides = [1, 1]} : vector<4x512xf32> to vector<4x497xf32>
    %13 = tpu.concatenate %11, %12 in 1 : vector<4x15xf32>, vector<4x497xf32> -> vector<4x512xf32>
    %cst_6 = arith.constant 0.000000e+00 : f32
    %14 = vector.broadcast %cst_6 : f32 to vector<4x1xf32>
    %15 = vector.extract_strided_slice %4 {offsets = [0, 0], sizes = [4, 511], strides = [1, 1]} : vector<4x512xf32> to vector<4x511xf32>
    %16 = tpu.concatenate %14, %15 in 1 : vector<4x1xf32>, vector<4x511xf32> -> vector<4x512xf32>
    %17 = vector.extract_strided_slice %4 {offsets = [0, 1], sizes = [4, 511], strides = [1, 1]} : vector<4x512xf32> to vector<4x511xf32>
    %cst_7 = arith.constant 0.000000e+00 : f32
    %18 = vector.broadcast %cst_7 : f32 to vector<4x1xf32>
    %19 = tpu.concatenate %17, %18 in 1 : vector<4x511xf32>, vector<4x1xf32> -> vector<4x512xf32>
    %20 = vector.extract_strided_slice %4 {offsets = [0, 15], sizes = [4, 497], strides = [1, 1]} : vector<4x512xf32> to vector<4x497xf32>
    %cst_8 = arith.constant 0.000000e+00 : f32
    %21 = vector.broadcast %cst_8 : f32 to vector<4x15xf32>
    %22 = tpu.concatenate %20, %21 in 1 : vector<4x497xf32>, vector<4x15xf32> -> vector<4x512xf32>
    %23 = vector.extract_strided_slice %4 {offsets = [0, 16], sizes = [4, 496], strides = [1, 1]} : vector<4x512xf32> to vector<4x496xf32>
    %cst_9 = arith.constant 0.000000e+00 : f32
    %24 = vector.broadcast %cst_9 : f32 to vector<4x16xf32>
    %25 = tpu.concatenate %23, %24 in 1 : vector<4x496xf32>, vector<4x16xf32> -> vector<4x512xf32>
    %26 = vector.extract_strided_slice %4 {offsets = [0, 17], sizes = [4, 495], strides = [1, 1]} : vector<4x512xf32> to vector<4x495xf32>
    %cst_10 = arith.constant 0.000000e+00 : f32
    %27 = vector.broadcast %cst_10 : f32 to vector<4x17xf32>
    %28 = tpu.concatenate %26, %27 in 1 : vector<4x495xf32>, vector<4x17xf32> -> vector<4x512xf32>
    %29 = tpu.concatenate %7, %10, %13, %16, %4, %19, %22, %25, %28 in 0 : vector<4x512xf32>, vector<4x512xf32>, vector<4x512xf32>, vector<4x512xf32>, vector<4x512xf32>, vector<4x512xf32>, vector<4x512xf32>, vector<4x512xf32>, vector<4x512xf32> -> vector<36x512xf32>
    %c0_11 = arith.constant 0 : index
    %c0_12 = arith.constant 0 : index
    %30 = vector.load %arg0[%c0_11, %c0_12] : memref<36x512xf32, #tpu.memory_space<vmem>>, vector<36x512xf32>
    %31 = arith.mulf %29, %30 : vector<36x512xf32>
    %c0_13 = arith.constant 0 : index
    %c0_14 = arith.constant 0 : index
    %32 = vector.load %arg3[%c0_13, %c0_14] : memref<16x36xf32, #tpu.memory_space<vmem>>, vector<16x36xf32>
    %cst_15 = arith.constant dense<0.000000e+00> : vector<16x512xf32>
    %33 = tpu.matmul %32, %31, %cst_15 {dimension_numbers = #tpu.dot_dimension_numbers<[1], [0], [0], [1], [0, 0, 1, 1], [], []>} : vector<16x36xf32>, vector<36x512xf32>, vector<16x512xf32> -> vector<16x512xf32>
    %34 = vector.extract_strided_slice %33 {offsets = [0, 0], sizes = [8, 512], strides = [1, 1]} : vector<16x512xf32> to vector<8x512xf32>
    %c0_16 = arith.constant 0 : index
    %c0_17 = arith.constant 0 : index
    %35 = vector.load %arg4[%c0_16, %c0_17] : memref<8x1xf32, #tpu.memory_space<vmem>>, vector<8x1xf32>
    %c0_18 = arith.constant 0 : index
    %c0_19 = arith.constant 0 : index
    %36 = vector.load %arg5[%c0_18, %c0_19] : memref<8x1xf32, #tpu.memory_space<vmem>>, vector<8x1xf32>
    %cst_20 = arith.constant dense<0.000000e+00> : vector<8xf32>
    %37 = vector.multi_reduction <add>, %34, %cst_20 [1] : vector<8x512xf32> to vector<8xf32>
    %38 = vector.shape_cast %37 : vector<8xf32> to vector<8x1xf32>
    %cst_21 = arith.constant 0.001953125 : f32
    %39 = vector.broadcast %cst_21 : f32 to vector<8x1xf32>
    %40 = arith.mulf %38, %39 : vector<8x1xf32>
    %41 = vector.broadcast %40 : vector<8x1xf32> to vector<8x512xf32>
    %42 = arith.subf %34, %41 : vector<8x512xf32>
    %43 = arith.mulf %42, %42 : vector<8x512xf32>
    %cst_22 = arith.constant dense<0.000000e+00> : vector<8xf32>
    %44 = vector.multi_reduction <add>, %43, %cst_22 [1] : vector<8x512xf32> to vector<8xf32>
    %45 = vector.shape_cast %44 : vector<8xf32> to vector<8x1xf32>
    %cst_23 = arith.constant 0.001953125 : f32
    %46 = vector.broadcast %cst_23 : f32 to vector<8x1xf32>
    %47 = arith.mulf %45, %46 : vector<8x1xf32>
    %cst_24 = arith.constant 9.99999974E-6 : f32
    %48 = vector.broadcast %cst_24 : f32 to vector<8x1xf32>
    %49 = arith.addf %47, %48 : vector<8x1xf32>
    %50 = math.rsqrt %49 : vector<8x1xf32>
    %51 = arith.mulf %35, %50 : vector<8x1xf32>
    %52 = vector.broadcast %51 : vector<8x1xf32> to vector<8x512xf32>
    %53 = arith.mulf %42, %52 : vector<8x512xf32>
    %54 = vector.broadcast %36 : vector<8x1xf32> to vector<8x512xf32>
    %55 = arith.addf %53, %54 : vector<8x512xf32>
    %cst_25 = arith.constant 0.000000e+00 : f32
    %56 = vector.broadcast %cst_25 : f32 to vector<8x512xf32>
    %57 = arith.maximumf %55, %56 : vector<8x512xf32>
    %58 = vector.extract_strided_slice %33 {offsets = [8, 0], sizes = [8, 512], strides = [1, 1]} : vector<16x512xf32> to vector<8x512xf32>
    %c0_26 = arith.constant 0 : index
    %c0_27 = arith.constant 0 : index
    %59 = vector.load %arg9[%c0_26, %c0_27] : memref<8x1xf32, #tpu.memory_space<vmem>>, vector<8x1xf32>
    %60 = vector.broadcast %59 : vector<8x1xf32> to vector<8x512xf32>
    %61 = arith.addf %58, %60 : vector<8x512xf32>
    %cst_28 = arith.constant 0.000000e+00 : f32
    %62 = vector.broadcast %cst_28 : f32 to vector<8x17xf32>
    %63 = vector.extract_strided_slice %57 {offsets = [0, 0], sizes = [8, 495], strides = [1, 1]} : vector<8x512xf32> to vector<8x495xf32>
    %64 = tpu.concatenate %62, %63 in 1 : vector<8x17xf32>, vector<8x495xf32> -> vector<8x512xf32>
    %cst_29 = arith.constant 0.000000e+00 : f32
    %65 = vector.broadcast %cst_29 : f32 to vector<8x16xf32>
    %66 = vector.extract_strided_slice %57 {offsets = [0, 0], sizes = [8, 496], strides = [1, 1]} : vector<8x512xf32> to vector<8x496xf32>
    %67 = tpu.concatenate %65, %66 in 1 : vector<8x16xf32>, vector<8x496xf32> -> vector<8x512xf32>
    %cst_30 = arith.constant 0.000000e+00 : f32
    %68 = vector.broadcast %cst_30 : f32 to vector<8x15xf32>
    %69 = vector.extract_strided_slice %57 {offsets = [0, 0], sizes = [8, 497], strides = [1, 1]} : vector<8x512xf32> to vector<8x497xf32>
    %70 = tpu.concatenate %68, %69 in 1 : vector<8x15xf32>, vector<8x497xf32> -> vector<8x512xf32>
    %cst_31 = arith.constant 0.000000e+00 : f32
    %71 = vector.broadcast %cst_31 : f32 to vector<8x1xf32>
    %72 = vector.extract_strided_slice %57 {offsets = [0, 0], sizes = [8, 511], strides = [1, 1]} : vector<8x512xf32> to vector<8x511xf32>
    %73 = tpu.concatenate %71, %72 in 1 : vector<8x1xf32>, vector<8x511xf32> -> vector<8x512xf32>
    %74 = vector.extract_strided_slice %57 {offsets = [0, 1], sizes = [8, 511], strides = [1, 1]} : vector<8x512xf32> to vector<8x511xf32>
    %cst_32 = arith.constant 0.000000e+00 : f32
    %75 = vector.broadcast %cst_32 : f32 to vector<8x1xf32>
    %76 = tpu.concatenate %74, %75 in 1 : vector<8x511xf32>, vector<8x1xf32> -> vector<8x512xf32>
    %77 = vector.extract_strided_slice %57 {offsets = [0, 15], sizes = [8, 497], strides = [1, 1]} : vector<8x512xf32> to vector<8x497xf32>
    %cst_33 = arith.constant 0.000000e+00 : f32
    %78 = vector.broadcast %cst_33 : f32 to vector<8x15xf32>
    %79 = tpu.concatenate %77, %78 in 1 : vector<8x497xf32>, vector<8x15xf32> -> vector<8x512xf32>
    %80 = vector.extract_strided_slice %57 {offsets = [0, 16], sizes = [8, 496], strides = [1, 1]} : vector<8x512xf32> to vector<8x496xf32>
    %cst_34 = arith.constant 0.000000e+00 : f32
    %81 = vector.broadcast %cst_34 : f32 to vector<8x16xf32>
    %82 = tpu.concatenate %80, %81 in 1 : vector<8x496xf32>, vector<8x16xf32> -> vector<8x512xf32>
    %83 = vector.extract_strided_slice %57 {offsets = [0, 17], sizes = [8, 495], strides = [1, 1]} : vector<8x512xf32> to vector<8x495xf32>
    %cst_35 = arith.constant 0.000000e+00 : f32
    %84 = vector.broadcast %cst_35 : f32 to vector<8x17xf32>
    %85 = tpu.concatenate %83, %84 in 1 : vector<8x495xf32>, vector<8x17xf32> -> vector<8x512xf32>
    %c0_36 = arith.constant 0 : index
    %c0_37 = arith.constant 0 : index
    %86 = vector.load %arg1[%c0_36, %c0_37] : memref<72x512xf32, #tpu.memory_space<vmem>>, vector<8x512xf32>
    %87 = arith.mulf %64, %86 : vector<8x512xf32>
    %c0_38 = arith.constant 0 : index
    %c0_39 = arith.constant 0 : index
    %88 = vector.load %arg11[%c0_38, %c0_39] : memref<72x512xf32, #tpu.memory_space<vmem>>, vector<8x512xf32>
    tpu.vector_store %arg11[%c0_38, %c0_39], %87 {strides = array<i32>} : memref<72x512xf32, #tpu.memory_space<vmem>>, vector<8x512xf32>,
    %c8 = arith.constant 8 : index
    %c0_40 = arith.constant 0 : index
    %89 = vector.load %arg1[%c8, %c0_40] : memref<72x512xf32, #tpu.memory_space<vmem>>, vector<8x512xf32>
    %90 = arith.mulf %67, %89 : vector<8x512xf32>
    %c8_41 = arith.constant 8 : index
    %c0_42 = arith.constant 0 : index
    %91 = vector.load %arg11[%c8_41, %c0_42] : memref<72x512xf32, #tpu.memory_space<vmem>>, vector<8x512xf32>
    tpu.vector_store %arg11[%c8_41, %c0_42], %90 {strides = array<i32>} : memref<72x512xf32, #tpu.memory_space<vmem>>, vector<8x512xf32>,
    %c16 = arith.constant 16 : index
    %c0_43 = arith.constant 0 : index
    %92 = vector.load %arg1[%c16, %c0_43] : memref<72x512xf32, #tpu.memory_space<vmem>>, vector<8x512xf32>
    %93 = arith.mulf %70, %92 : vector<8x512xf32>
    %c16_44 = arith.constant 16 : index
    %c0_45 = arith.constant 0 : index
    %94 = vector.load %arg11[%c16_44, %c0_45] : memref<72x512xf32, #tpu.memory_space<vmem>>, vector<8x512xf32>
    tpu.vector_store %arg11[%c16_44, %c0_45], %93 {strides = array<i32>} : memref<72x512xf32, #tpu.memory_space<vmem>>, vector<8x512xf32>,
    %c24 = arith.constant 24 : index
    %c0_46 = arith.constant 0 : index
    %95 = vector.load %arg1[%c24, %c0_46] : memref<72x512xf32, #tpu.memory_space<vmem>>, vector<8x512xf32>
    %96 = arith.mulf %73, %95 : vector<8x512xf32>
    %c24_47 = arith.constant 24 : index
    %c0_48 = arith.constant 0 : index
    %97 = vector.load %arg11[%c24_47, %c0_48] : memref<72x512xf32, #tpu.memory_space<vmem>>, vector<8x512xf32>
    tpu.vector_store %arg11[%c24_47, %c0_48], %96 {strides = array<i32>} : memref<72x512xf32, #tpu.memory_space<vmem>>, vector<8x512xf32>,
    %c32 = arith.constant 32 : index
    %c0_49 = arith.constant 0 : index
    %98 = vector.load %arg1[%c32, %c0_49] : memref<72x512xf32, #tpu.memory_space<vmem>>, vector<8x512xf32>
    %99 = arith.mulf %57, %98 : vector<8x512xf32>
    %c32_50 = arith.constant 32 : index
    %c0_51 = arith.constant 0 : index
    %100 = vector.load %arg11[%c32_50, %c0_51] : memref<72x512xf32, #tpu.memory_space<vmem>>, vector<8x512xf32>
    tpu.vector_store %arg11[%c32_50, %c0_51], %99 {strides = array<i32>} : memref<72x512xf32, #tpu.memory_space<vmem>>, vector<8x512xf32>,
    %c40 = arith.constant 40 : index
    %c0_52 = arith.constant 0 : index
    %101 = vector.load %arg1[%c40, %c0_52] : memref<72x512xf32, #tpu.memory_space<vmem>>, vector<8x512xf32>
    %102 = arith.mulf %76, %101 : vector<8x512xf32>
    %c40_53 = arith.constant 40 : index
    %c0_54 = arith.constant 0 : index
    %103 = vector.load %arg11[%c40_53, %c0_54] : memref<72x512xf32, #tpu.memory_space<vmem>>, vector<8x512xf32>
    tpu.vector_store %arg11[%c40_53, %c0_54], %102 {strides = array<i32>} : memref<72x512xf32, #tpu.memory_space<vmem>>, vector<8x512xf32>,
    %c48 = arith.constant 48 : index
    %c0_55 = arith.constant 0 : index
    %104 = vector.load %arg1[%c48, %c0_55] : memref<72x512xf32, #tpu.memory_space<vmem>>, vector<8x512xf32>
    %105 = arith.mulf %79, %104 : vector<8x512xf32>
    %c48_56 = arith.constant 48 : index
    %c0_57 = arith.constant 0 : index
    %106 = vector.load %arg11[%c48_56, %c0_57] : memref<72x512xf32, #tpu.memory_space<vmem>>, vector<8x512xf32>
    tpu.vector_store %arg11[%c48_56, %c0_57], %105 {strides = array<i32>} : memref<72x512xf32, #tpu.memory_space<vmem>>, vector<8x512xf32>,
    %c56 = arith.constant 56 : index
    %c0_58 = arith.constant 0 : index
    %107 = vector.load %arg1[%c56, %c0_58] : memref<72x512xf32, #tpu.memory_space<vmem>>, vector<8x512xf32>
    %108 = arith.mulf %82, %107 : vector<8x512xf32>
    %c56_59 = arith.constant 56 : index
    %c0_60 = arith.constant 0 : index
    %109 = vector.load %arg11[%c56_59, %c0_60] : memref<72x512xf32, #tpu.memory_space<vmem>>, vector<8x512xf32>
    tpu.vector_store %arg11[%c56_59, %c0_60], %108 {strides = array<i32>} : memref<72x512xf32, #tpu.memory_space<vmem>>, vector<8x512xf32>,
    %c64 = arith.constant 64 : index
    %c0_61 = arith.constant 0 : index
    %110 = vector.load %arg1[%c64, %c0_61] : memref<72x512xf32, #tpu.memory_space<vmem>>, vector<8x512xf32>
    %111 = arith.mulf %85, %110 : vector<8x512xf32>
    %c64_62 = arith.constant 64 : index
    %c0_63 = arith.constant 0 : index
    %112 = vector.load %arg11[%c64_62, %c0_63] : memref<72x512xf32, #tpu.memory_space<vmem>>, vector<8x512xf32>
    tpu.vector_store %arg11[%c64_62, %c0_63], %111 {strides = array<i32>} : memref<72x512xf32, #tpu.memory_space<vmem>>, vector<8x512xf32>,
    %c0_64 = arith.constant 0 : index
    %c0_65 = arith.constant 0 : index
    %113 = vector.load %arg6[%c0_64, %c0_65] : memref<8x72xf32, #tpu.memory_space<vmem>>, vector<8x72xf32>
    %c0_66 = arith.constant 0 : index
    %c0_67 = arith.constant 0 : index
    %114 = vector.load %arg11[%c0_66, %c0_67] : memref<72x512xf32, #tpu.memory_space<vmem>>, vector<72x512xf32>
    %cst_68 = arith.constant dense<0.000000e+00> : vector<8x512xf32>
    %115 = tpu.matmul %113, %114, %cst_68 {dimension_numbers = #tpu.dot_dimension_numbers<[1], [0], [0], [1], [0, 0, 1, 1], [], []>} : vector<8x72xf32>, vector<72x512xf32>, vector<8x512xf32> -> vector<8x512xf32>
    %c0_69 = arith.constant 0 : index
    %c0_70 = arith.constant 0 : index
    %116 = vector.load %arg7[%c0_69, %c0_70] : memref<8x1xf32, #tpu.memory_space<vmem>>, vector<8x1xf32>
    %c0_71 = arith.constant 0 : index
    %c0_72 = arith.constant 0 : index
    %117 = vector.load %arg8[%c0_71, %c0_72] : memref<8x1xf32, #tpu.memory_space<vmem>>, vector<8x1xf32>
    %cst_73 = arith.constant dense<0.000000e+00> : vector<8xf32>
    %118 = vector.multi_reduction <add>, %115, %cst_73 [1] : vector<8x512xf32> to vector<8xf32>
    %119 = vector.shape_cast %118 : vector<8xf32> to vector<8x1xf32>
    %cst_74 = arith.constant 0.001953125 : f32
    %120 = vector.broadcast %cst_74 : f32 to vector<8x1xf32>
    %121 = arith.mulf %119, %120 : vector<8x1xf32>
    %122 = vector.broadcast %121 : vector<8x1xf32> to vector<8x512xf32>
    %123 = arith.subf %115, %122 : vector<8x512xf32>
    %124 = arith.mulf %123, %123 : vector<8x512xf32>
    %cst_75 = arith.constant dense<0.000000e+00> : vector<8xf32>
    %125 = vector.multi_reduction <add>, %124, %cst_75 [1] : vector<8x512xf32> to vector<8xf32>
    %126 = vector.shape_cast %125 : vector<8xf32> to vector<8x1xf32>
    %cst_76 = arith.constant 0.001953125 : f32
    %127 = vector.broadcast %cst_76 : f32 to vector<8x1xf32>
    %128 = arith.mulf %126, %127 : vector<8x1xf32>
    %cst_77 = arith.constant 9.99999974E-6 : f32
    %129 = vector.broadcast %cst_77 : f32 to vector<8x1xf32>
    %130 = arith.addf %128, %129 : vector<8x1xf32>
    %131 = math.rsqrt %130 : vector<8x1xf32>
    %132 = arith.mulf %116, %131 : vector<8x1xf32>
    %133 = vector.broadcast %132 : vector<8x1xf32> to vector<8x512xf32>
    %134 = arith.mulf %123, %133 : vector<8x512xf32>
    %135 = vector.broadcast %117 : vector<8x1xf32> to vector<8x512xf32>
    %136 = arith.addf %134, %135 : vector<8x512xf32>
    %137 = arith.addf %136, %61 : vector<8x512xf32>
    %cst_78 = arith.constant 0.000000e+00 : f32
    %138 = vector.broadcast %cst_78 : f32 to vector<8x512xf32>
    %139 = arith.maximumf %137, %138 : vector<8x512xf32>
    %140 = vector.extract_strided_slice %139 {offsets = [0, 0], sizes = [8, 256], strides = [1, 1]} : vector<8x512xf32> to vector<8x256xf32>
    %c0_79 = arith.constant 0 : index
    %c0_80 = arith.constant 0 : index
    %c0_81 = arith.constant 0 : index
    %141 = vector.load %arg10[%c0_79, %c0_80, %c0_81] : memref<2x8x256xf32, #tpu.memory_space<vmem>>, vector<1x8x256xf32>
    %142 = vector.shape_cast %141 : vector<1x8x256xf32> to vector<8x256xf32>
    %143 = vector.shape_cast %140 : vector<8x256xf32> to vector<1x8x256xf32>
    tpu.vector_store %arg10[%c0_79, %c0_80, %c0_81], %143 {strides = array<i32>} : memref<2x8x256xf32, #tpu.memory_space<vmem>>, vector<1x8x256xf32>,
    %144 = vector.extract_strided_slice %139 {offsets = [0, 256], sizes = [8, 256], strides = [1, 1]} : vector<8x512xf32> to vector<8x256xf32>
    %c1_82 = arith.constant 1 : index
    %c0_83 = arith.constant 0 : index
    %c0_84 = arith.constant 0 : index
    %145 = vector.load %arg10[%c1_82, %c0_83, %c0_84] : memref<2x8x256xf32, #tpu.memory_space<vmem>>, vector<1x8x256xf32>
    %146 = vector.shape_cast %145 : vector<1x8x256xf32> to vector<8x256xf32>
    %147 = vector.shape_cast %144 : vector<8x256xf32> to vector<1x8x256xf32>
    tpu.vector_store %arg10[%c1_82, %c0_83, %c0_84], %147 {strides = array<i32>} : memref<2x8x256xf32, #tpu.memory_space<vmem>>, vector<1x8x256xf32>,
    return
  }
}

</mosaic_0001>

<bundles_post_ra>
// kernel: conv_block_forward.1
= control target key start
LH: loop header
LB: loop body
LE: loop exit
PB: predicated region body
PF: predicated region fallthrough
CT: control target
= control target key end

     0   :  { %s1007_s17 = smov 112   ;;  %s1008_s18 = smov 111   ;;  %v1015_v4 = vmov 0.0   ;;  %vm159_vm0 = vcmask 908288   ;;  %vm204_vm1 = vcmask 1043456   ;;  %vm145_vm2 = vcmask 916480   ;;  %s1562_s2 = inlined_call_operand.vmem [shape: f32[2,4,256], index: 2, kind: input, shape index: {}]   ;;  %s1563_s0 = inlined_call_operand.vmem [shape: f32[36,512], index: 0, kind: input, shape index: {}]   ;;  %s1564_s3 = inlined_call_operand.vmem [shape: f32[16,36], index: 3, kind: input, shape index: {}]   ;;  %s1565_s5 = inlined_call_operand.vmem [shape: f32[8,1], index: 5, kind: input, shape index: {}]   ;;  %s1566_s4 = inlined_call_operand.vmem [shape: f32[8,1], index: 4, kind: input, shape index: {}]   ;;  %s1567_s1 = inlined_call_operand.vmem [shape: f32[72,512], index: 1, kind: input, shape index: {}]   ;;  %s1568_s6 = inlined_call_operand.vmem [shape: f32[8,72], index: 6, kind: input, shape index: {}]   ;;  %s1569_s9 = inlined_call_operand.vmem [shape: f32[8,1], index: 9, kind: input, shape index: {}]   ;;  %s1570_s7 = inlined_call_operand.vmem [shape: f32[8,1], index: 7, kind: input, shape index: {}]   ;;  %s1571_s8 = inlined_call_operand.vmem [shape: f32[8,1], index: 8, kind: input, shape index: {}]   ;;  %s1572_s10 = inlined_call_operand.vmem [shape: f32[2,8,256], index: 10, kind: output, shape index: {}]  }
   0x1   :  { %v1075_v0 = vld [vmem:[%s1562_s2 + $0x8] sm:$0xff]  ;;  %v1080_v1 = vld [vmem:[%s1562_s2] sm:$0xff]  ;;  %s1009_s2 = smov 127   ;;  %s1010_s19 = smov 113   ;;  %346 = vmatprep.mubr.f32.mxu0 %v1015_v4  ;;  %423 = vmatprep.mubr.f32.mxu1 %v1015_v4  ;;  %vm114_vm3 = vcmask 1039360   ;;  %vm128_vm4 = vcmask 924672  }
   0x2   :  { %141 = vrot.lane.b32.xlu0 %v1075_v0, %s1007_s17  ;;  %137 = vrot.lane.b32.xlu1 %v1080_v1, %s1007_s17  ;;  %v1088_v2 = vcombine.high %v1080_v1, %v1080_v1  ;;  %s1011_s20 = smov 1   ;;  %v1116_v3 = vcombine.high %v1075_v0, %v1075_v0  ;;  %s1012_s21 = smov 16   ;;  %v238_v9 = vld [vmem:[%s1563_s0 + $0x88] sm:$0xf]  ;;  %v237_v18 = vld [vmem:[%s1563_s0 + $0x80] sm:$0xf] }
   0x3   :  { %s1013_s22 = smov 15   ;;  %s1014_s23 = smov 17   ;;  %v234_v22 = vld [vmem:[%s1563_s0 + $0x68] sm:$0xff]  ;;  %v233_v33 = vld [vmem:[%s1563_s0 + $0x60] sm:$0xff]  ;;  %v239_v47 = vld [vmem:[%s1563_s0 + $0x90] sm:$0xf] }
   0x4   :  { %v230_v37 = vld [vmem:[%s1563_s0 + $0x48] sm:$0xff]  ;;  %v229_v40 = vld [vmem:[%s1563_s0 + $0x40] sm:$0xff]  ;;  %v240_v48 = vld [vmem:[%s1563_s0 + $0x98] sm:$0xf]  ;;  %vm100_vm5 = vcmask 7168   ;;  %vm83_vm6 = vcmask 121856  }
   0x5   :  { %vm69_vm7 = vcmask 130048   ;;  %v226_v63 = vld [vmem:[%s1563_s0 + $0x28] sm:$0xff]  ;;  %vm52_vm8 = vcmask 138240   ;;  %vm263_vm9 = vcmask 293888   ;;  %vm770_vm10 = vcmask 588800  }
   0x6   :  { %153 = vrot.lane.b32.xlu1 %v1088_v2, %s1008_s18  ;;  %139 = vrot.lane.b32.xlu0 %v1088_v2, %s1007_s17 }
   0xa   :  { %108 = vrot.lane.b32.xlu1 %v1088_v2, %s1009_s2  ;;  %155 = vrot.lane.b32.xlu0 %v1075_v0, %s1008_s18 }
   0xe   :  { %122 = vrot.lane.b32.xlu1 %v1088_v2, %s1010_s19  ;;  %110 = vrot.lane.b32.xlu0 %v1075_v0, %s1009_s2 }
  0x12   :  { %151 = vrot.lane.b32.xlu1 %v1080_v1, %s1008_s18  ;;  %124 = vrot.lane.b32.xlu0 %v1075_v0, %s1010_s19 }
  0x16   :  { %120 = vrot.lane.b32.xlu1 %v1080_v1, %s1010_s19  ;;  %106 = vrot.lane.b32.xlu0 %v1080_v1, %s1009_s2 }
  0x1a   :  { %94 = vrot.lane.b32.xlu1 %v1088_v2, %s1011_s20  ;;  %92 = vrot.lane.b32.xlu0 %v1080_v1, %s1011_s20 }
  0x1e   :  { %157 = vrot.lane.b32.xlu1 %v1116_v3, %s1008_s18  ;;  %143 = vrot.lane.b32.xlu0 %v1116_v3, %s1007_s17 }
  0x22   :  { %63 = vrot.lane.b32.xlu1 %v1088_v2, %s1012_s21  ;;  %61 = vrot.lane.b32.xlu0 %v1080_v1, %s1012_s21 }
  0x26   :  { %77 = vrot.lane.b32.xlu1 %v1088_v2, %s1013_s22  ;;  %75 = vrot.lane.b32.xlu0 %v1080_v1, %s1013_s22 }
  0x2a   :  { %126 = vrot.lane.b32.xlu1 %v1116_v3, %s1010_s19  ;;  %112 = vrot.lane.b32.xlu0 %v1116_v3, %s1009_s2 }
  0x2e   :  { %46 = vrot.lane.b32.xlu1 %v1088_v2, %s1014_s23  ;;  %44 = vrot.lane.b32.xlu0 %v1080_v1, %s1014_s23 }
  0x32   :  { %98 = vrot.lane.b32.xlu1 %v1116_v3, %s1011_s20  ;;  %96 = vrot.lane.b32.xlu0 %v1075_v0, %s1011_s20 }
  0x36   :  { %67 = vrot.lane.b32.xlu1 %v1116_v3, %s1012_s21  ;;  %65 = vrot.lane.b32.xlu0 %v1075_v0, %s1012_s21 }
  0x3a   :  { %81 = vrot.lane.b32.xlu1 %v1116_v3, %s1013_s22  ;;  %79 = vrot.lane.b32.xlu0 %v1075_v0, %s1013_s22 }
  0x3e   :  { %50 = vrot.lane.b32.xlu1 %v1116_v3, %s1014_s23  ;;  %48 = vrot.lane.b32.xlu0 %v1075_v0, %s1014_s23 }
  0x74   :  { %v1156_v5 = vpop.permute.xlu0 %141  ;;  %v138_v6 = vpop.permute.xlu1 %137 }
  0x78   :  { %v154_v7 = vpop.permute.xlu1 %153  ;;  %v140_v8 = vpop.permute.xlu0 %139 }
  0x79   :  { %v147_v16 = vsel %vm145_vm2, %v140_v8, %v1156_v5  ;;  %v146_v23 = vsel %vm145_vm2, %v138_v6, %v140_v8 }
  0x7a   :  { %v197_v19 = vrot.slane %v147_v16, 4  ;;  %v196_v30 = vrot.slane %v146_v23, 4 }
  0x7c   :  { %v109_v10 = vpop.permute.xlu1 %108  ;;  %v156_v11 = vpop.permute.xlu0 %155 }
  0x7d   :  { %v161_v12 = vsel %vm159_vm0, %v154_v7, %v156_v11 }
  0x7e   :  { %v258_v13 = vmul.f32 %v238_v9, %v161_v12 }
  0x80   :  { %v123_v14 = vpop.permute.xlu1 %122  ;;  %v1162_v15 = vpop.permute.xlu0 %110  ;;  %977 = vmatprep.subr.msk.mxu0 %vm204_vm1, %v258_v13 }
  0x81   :  { %v116_v17 = vsel %vm114_vm3, %v109_v10, %v1162_v15 }
  0x82   :  { %v188_v24 = vrot.slane %v116_v17, 4 }
  0x84   :  { %v152_v20 = vpop.permute.xlu1 %151  ;;  %v1172_v21 = vpop.permute.xlu0 %124  ;;  %v214_v36 = vsel %vm204_vm1, %v1088_v2, %v188_v24 }
  0x85   :  { %v160_v25 = vsel %vm159_vm0, %v152_v20, %v154_v7  ;;  %v130_v26 = vsel %vm128_vm4, %v123_v14, %v1172_v21  ;;  %v250_v44 = vmul.f32 %v230_v37, %v214_v36  ;;  %v235_v20 = vld [vmem:[%s1563_s0 + $0x70] sm:$0xff] }
  0x86   :  { %v257_v27 = vmul.f32 %v237_v18, %v160_v25  ;;  %v218_v28 = vsel %vm204_vm1, %v130_v26, %v197_v19  ;;  %v236_v19 = vld [vmem:[%s1563_s0 + $0x78] sm:$0xff] }
  0x87   :  { %v254_v29 = vmul.f32 %v234_v22, %v218_v28 }
  0x88   :  { %v121_v31 = vpop.permute.xlu1 %120  ;;  %v107_v32 = vpop.permute.xlu0 %106  ;;  %978 = vmatpush1.msk.msra.mxu0 %vm204_vm1, %v257_v27 }
  0x89   :  { %v129_v34 = vsel %vm128_vm4, %v121_v31, %v123_v14  ;;  %v115_v35 = vsel %vm114_vm3, %v107_v32, %v109_v10  ;;  %306 = vmatprep.subr.mxu0 %v254_v29 }
  0x8a   :  { %v217_v38 = vsel %vm204_vm1, %v129_v34, %v196_v30  ;;  %v187_v39 = vrot.slane %v115_v35, 4  ;;  %v232_v30 = vld [vmem:[%s1563_s0 + $0x58] sm:$0xff] }
  0x8b   :  { %v253_v41 = vmul.f32 %v233_v33, %v217_v38  ;;  %v222_v38 = vld [vmem:[%s1563_s0 + $0x8] sm:$0xff] }
  0x8c   :  { %v1197_v42 = vpop.permute.xlu1 %94  ;;  %v93_v43 = vpop.permute.xlu0 %92  ;;  %v213_v45 = vsel %vm204_vm1, %v1080_v1, %v187_v39  ;;  %v225_v1 = vld [vmem:[%s1563_s0 + $0x20] sm:$0xff] }
  0x8d   :  { %307 = vmatpush1.msra.mxu0 %v253_v41  ;;  %v249_v46 = vmul.f32 %v229_v40, %v213_v45  ;;  %v101_v57 = vsel %vm100_vm5, %v93_v43, %v1197_v42  ;;  %v105_v58 = vsel %vm100_vm5, 0.0, %v93_v43  ;;  %v221_v39 = vld [vmem:[%s1563_s0] sm:$0xff] }
  0x8e   :  { %308 = vmatprep.subr.mxu0 %v250_v44  ;;  %v178_v59 = vrot.slane %v105_v58, 4  ;;  %v179_v60 = vrot.slane %v101_v57, 4 }
  0x8f   :  { %309 = vmatpush1.msra.mxu0 %v249_v46 }
  0x90   :  { %v158_v49 = vpop.permute.xlu1 %157  ;;  %v144_v50 = vpop.permute.xlu0 %143 }
  0x91   :  { %v162_v51 = vsel %vm159_vm0, %v156_v11, %v158_v49  ;;  %v167_v52 = vsel %vm159_vm0, %v158_v49, 0.0  ;;  %v148_v2 = vsel %vm145_vm2, %v1156_v5, %v144_v50  ;;  %v150_v6 = vsel %vm145_vm2, %v144_v50, 0.0  ;;  %v261_v49 = vld [vmem:[%s1564_s3] sm:$0xff] }
  0x92   :  { %v259_v53 = vmul.f32 %v239_v47, %v162_v51  ;;  %v260_v54 = vmul.f32 %v240_v48, %v167_v52  ;;  %v198_v13 = vrot.slane %v148_v2, 4  ;;  %v199_v14 = vrot.slane %v150_v6, 4 }
  0x94   :  { %v1209_v55 = vpop.permute.xlu1 %63  ;;  %v62_v56 = vpop.permute.xlu0 %61  ;;  %981 = vmatprep.subr.msk.mxu1 %vm204_vm1, %v260_v54 }
  0x95   :  { %982 = vmatpush1.msk.msra.mxu1 %vm204_vm1, %v259_v53  ;;  %v70_v16 = vsel %vm69_vm7, %v62_v56, %v1209_v55  ;;  %v74_v5 = vsel %vm69_vm7, 0.0, %v62_v56 }
  0x96   :  { %v169_v32 = vrot.slane %v74_v5, 4  ;;  %v170_v33 = vrot.slane %v70_v16, 4 }
  0x98   :  { %v1216_v61 = vpop.permute.xlu1 %77  ;;  %v76_v62 = vpop.permute.xlu0 %75 }
  0x99   :  { %v84_v7 = vsel %vm83_vm6, %v76_v62, %v1216_v61  ;;  %v91_v8 = vsel %vm83_vm6, 0.0, %v76_v62 }
  0x9a   :  { %v209_v9 = vsel %vm204_vm1, %v91_v8, %v178_v59  ;;  %v210_v10 = vsel %vm204_vm1, %v84_v7, %v179_v60  ;;  %v228_v59 = vld [vmem:[%s1563_s0 + $0x38] sm:$0xff]  ;;  %v227_v60 = vld [vmem:[%s1563_s0 + $0x30] sm:$0xff] }
  0x9b   :  { %v246_v11 = vmul.f32 %v226_v63, %v210_v10  ;;  %v245_v12 = vmul.f32 %v225_v1, %v209_v9 }
  0x9c   :  { %v127_v17 = vpop.permute.xlu1 %126  ;;  %v113_v18 = vpop.permute.xlu0 %112 }
  0x9d   :  { %v131_v22 = vsel %vm128_vm4, %v1172_v21, %v127_v17  ;;  %v136_v23 = vsel %vm128_vm4, %v127_v17, 0.0  ;;  %v117_v24 = vsel %vm114_vm3, %v1162_v15, %v113_v18  ;;  %v119_v25 = vsel %vm114_vm3, %v113_v18, 0.0  ;;  %310 = vmatprep.subr.mxu0 %v246_v11  ;;  %v231_v21 = vld [vmem:[%s1563_s0 + $0x50] sm:$0xff] }
  0x9e   :  { %v219_v26 = vsel %vm204_vm1, %v131_v22, %v198_v13  ;;  %v220_v27 = vsel %vm204_vm1, %v136_v23, %v199_v14  ;;  %v189_v28 = vrot.slane %v117_v24, 4  ;;  %v190_v29 = vrot.slane %v119_v25, 4  ;;  %311 = vmatpush1.msra.mxu0 %v245_v12 }
  0x9f   :  { %v256_v31 = vmul.f32 %v236_v19, %v220_v27  ;;  %v255_v15 = vmul.f32 %v235_v20, %v219_v26 }
  0xa0   :  { %v47_v34 = vpop.permute.xlu1 %46  ;;  %v45_v35 = vpop.permute.xlu0 %44  ;;  %v216_v36 = vsel %vm204_vm1, %v1116_v3, %v190_v29  ;;  %v215_v37 = vsel %vm204_vm1, %v1075_v0, %v189_v28 }
  0xa1   :  { %v53_v40 = vsel %vm52_vm8, %v45_v35, %v47_v34  ;;  %v60_v41 = vsel %vm52_vm8, 0.0, %v45_v35  ;;  %383 = vmatprep.subr.mxu1 %v256_v31  ;;  %v252_v43 = vmul.f32 %v232_v30, %v216_v36  ;;  %v251_v44 = vmul.f32 %v231_v21, %v215_v37 }
  0xa2   :  { %v205_v3 = vsel %vm204_vm1, %v60_v41, %v169_v32  ;;  %v206_v45 = vsel %vm204_vm1, %v53_v40, %v170_v33  ;;  %384 = vmatpush1.msra.mxu1 %v255_v15 }
  0xa3   :  { %385 = vmatprep.subr.mxu1 %v252_v43  ;;  %v242_v0 = vmul.f32 %v222_v38, %v206_v45  ;;  %v241_v46 = vmul.f32 %v221_v39, %v205_v3  ;;  %v1016_v38 = vmov 0   ;;  %v437_v39 = vld [vmem:[%s1565_s5] sm:$0xff] }
  0xa4   :  { %v99_v47 = vpop.permute.xlu1 %98  ;;  %v97_v48 = vpop.permute.xlu0 %96  ;;  %386 = vmatpush1.msra.mxu1 %v251_v44  ;;  %999 = vset.pattern.permute.xlu0 %v1016_v38  ;;  %v436_v44 = vld [vmem:[%s1566_s4] sm:$0xff] }
  0xa5   :  { %312 = vmatprep.subr.mxu0 %v242_v0  ;;  %v102_v52 = vsel %vm100_vm5, %v1197_v42, %v97_v48  ;;  %v103_v53 = vsel %vm100_vm5, %v97_v48, %v99_v47  ;;  %1000 = vset.pattern.permute.xlu1 %v1016_v38 }
  0xa6   :  { %313 = vmatpush1.msra.mxu0 %v241_v46  ;;  %v180_v54 = vrot.slane %v102_v52, 4  ;;  %v181_v56 = vrot.slane %v103_v53, 4 }
  0xa7   :  { %979 = vmatmul.mubr.msk.f32.vlgmr.msra.gmra.mxu0 %vm263_vm9, %v261_v49 }
  0xa8   :  { %v68_v50 = vpop.permute.xlu1 %67  ;;  %v66_v51 = vpop.permute.xlu0 %65  ;;  %352 = vmatprep.mubr.f32.mxu0 %v1015_v4 }
  0xa9   :  { %v71_v62 = vsel %vm69_vm7, %v1209_v55, %v66_v51  ;;  %v72_v63 = vsel %vm69_vm7, %v66_v51, %v68_v50  ;;  %v224_v55 = vld [vmem:[%s1563_s0 + $0x18] sm:$0xff] }
  0xaa   :  { %v171_v9 = vrot.slane %v71_v62, 4  ;;  %v172_v10 = vrot.slane %v72_v63, 4 }
  0xac   :  { %v82_v57 = vpop.permute.xlu1 %81  ;;  %v80_v58 = vpop.permute.xlu0 %79 }
  0xad   :  { %v85_v42 = vsel %vm83_vm6, %v1216_v61, %v80_v58  ;;  %v86_v1 = vsel %vm83_vm6, %v80_v58, %v82_v57  ;;  %v223_v61 = vld [vmem:[%s1563_s0 + $0x10] sm:$0xff] }
  0xae   :  { %v211_v2 = vsel %vm204_vm1, %v85_v42, %v180_v54  ;;  %v212_v6 = vsel %vm204_vm1, %v86_v1, %v181_v56  ;;  %v722_v42 = vld [vmem:[%s1567_s1 + $0x108] sm:$0xff]  ;;  %v723_v1 = vld [vmem:[%s1567_s1 + $0x110] sm:$0xff] }
  0xaf   :  { %v248_v7 = vmul.f32 %v228_v59, %v212_v6  ;;  %v247_v8 = vmul.f32 %v227_v60, %v211_v2  ;;  %v262_v60 = vld [vmem:[%s1564_s3 + $0x8] sm:$0xff] }
  0xb0   :  { %v51_v11 = vpop.permute.xlu1 %50  ;;  %v49_v12 = vpop.permute.xlu0 %48  ;;  %980 = vmatmul.mubr.msk.f32.gmra.mxu0 %vm263_vm9, %v262_v60 }
  0xb1   :  { %v54_v13 = vsel %vm52_vm8, %v47_v34, %v49_v12  ;;  %v55_v14 = vsel %vm52_vm8, %v49_v12, %v51_v11  ;;  %387 = vmatprep.subr.mxu1 %v248_v7  ;;  %838 = vmatprep.mubr.f32.mxu0 %v1015_v4 }
  0xb2   :  { %v207_v16 = vsel %vm204_vm1, %v54_v13, %v171_v9  ;;  %v208_v5 = vsel %vm204_vm1, %v55_v14, %v172_v10  ;;  %388 = vmatpush1.msra.mxu1 %v247_v8 }
  0xb3   :  { %v244_v17 = vmul.f32 %v224_v55, %v208_v5  ;;  %v243_v18 = vmul.f32 %v223_v61, %v207_v16  ;;  %v721_v55 = vld [vmem:[%s1567_s1 + $0x100] sm:$0xff]  ;;  %v712_v5 = vld [vmem:[%s1567_s1 + $0xf8] sm:$0xff] }
  0xb5   :  { %389 = vmatprep.subr.mxu1 %v244_v17 }
  0xb6   :  { %390 = vmatpush1.msra.mxu1 %v243_v18 }
  0xb7   :  { %983 = vmatmul.mubr.msk.f32.vlgmr.msra.gmra.mxu1 %vm263_vm9, %v261_v49 }
  0xb8   :  { %429 = vmatprep.mubr.f32.mxu1 %v1015_v4 }
  0xbb   :  { %984 = vmatmul.mubr.msk.f32.gmra.mxu1 %vm263_vm9, %v262_v60  ;;  %v673_v60 = vld [vmem:[%s1567_s1 + $0x80] sm:$0xff] }
  0xbc   :  { %909 = vmatprep.mubr.f32.mxu1 %v1015_v4  ;;  %v724_v4 = vld [vmem:[%s1567_s1 + $0x118] sm:$0xff] }
 0x167   :  { %v348_v19 = vpop.f32.mrf.mxu0 }
 0x169   :  { %v350_v20 = vpop.f32.mrf.mxu0 }
 0x16a   :  { %v438_v22 = vadd.f32 %v350_v20, %v348_v19 }
 0x177   :  { %v425_v23 = vpop.f32.mrf.mxu1 }
 0x178   :  { %v439_v24 = vadd.f32 %v438_v22, %v425_v23  ;;  %v700_v22 = vld [vmem:[%s1567_s1 + $0xd8] sm:$0xff] }
 0x179   :  { %v427_v25 = vpop.f32.mrf.mxu1 }
 0x17a   :  { %v440_v26 = vadd.f32 %v439_v24, %v427_v25  ;;  %v711_v24 = vld [vmem:[%s1567_s1 + $0xf0] sm:$0xff] }
 0x17c   :  { %441 = vadd.xlane.f32.xlu0 %v440_v26 }
 0x205   :  { %v442_v27 = vpop.xlane.xlu0 %441 }
 0x206   :  { %v443_v28 = vmul.f32 0.001953125, %v442_v27 }
 0x208   :  { %v444_v29 = vsub.f32 %v348_v19, %v443_v28  ;;  %v445_v30 = vsub.f32 %v350_v20, %v443_v28  ;;  %v446_v21 = vsub.f32 %v425_v23, %v443_v28  ;;  %v447_v31 = vsub.f32 %v427_v25, %v443_v28  ;;  %v710_v23 = vld [vmem:[%s1567_s1 + $0xe8] sm:$0xff] }
 0x20a   :  { %v448_v15 = vmul.f32 %v444_v29, %v444_v29  ;;  %v449_v32 = vmul.f32 %v445_v30, %v445_v30  ;;  %v450_v33 = vmul.f32 %v446_v21, %v446_v21  ;;  %v451_v35 = vmul.f32 %v447_v31, %v447_v31 }
 0x20c   :  { %v452_v34 = vadd.f32 %v449_v32, %v448_v15  ;;  %v709_v15 = vld [vmem:[%s1567_s1 + $0xe0] sm:$0xff] }
 0x20e   :  { %v453_v36 = vadd.f32 %v452_v34, %v450_v33 }
 0x210   :  { %v454_v37 = vadd.f32 %v453_v36, %v451_v35  ;;  %v698_v35 = vld [vmem:[%s1567_s1 + $0xc8] sm:$0xff]  ;;  %v699_v36 = vld [vmem:[%s1567_s1 + $0xd0] sm:$0xff] }
 0x212   :  { %455 = vadd.xlane.f32.xlu1 %v454_v37 }
 0x223   :  { %472 = vperm.xlu1 %1000, %v437_v39  }
 0x29b   :  { %v456_v40 = vpop.xlane.xlu1 %455 }
 0x29c   :  { %v457_v41 = vmul.f32 0.001953125, %v456_v40 }
 0x29e   :  { %v458_v43 = vadd.f32 1e-05, %v457_v41 }
 0x29f   :  { %v473_v46 = vpop.permute.xlu1 %472 }
 0x2a0   :  { %1003 = vrsqrt.f32 %v458_v43  ;;  %v697_v43 = vld [vmem:[%s1567_s1 + $0xc0] sm:$0xff] }
 0x2ad   :  { %v1004_v3 = vpop.eup %1003 }
 0x2ae   :  { %v460_v45 = vmul.f32 %v1004_v3, %v436_v44 }
 0x2b0   :  { %463 = vperm.xlu0 %999, %v460_v45  }
 0x32b   :  { %v464_v0 = vpop.permute.xlu0 %463 }
 0x32c   :  { %v467_v47 = vmul.f32 %v464_v0, %v445_v30  ;;  %v468_v48 = vmul.f32 %v464_v0, %v446_v21  ;;  %v469_v49 = vmul.f32 %v464_v0, %v447_v31  ;;  %v466_v51 = vmul.f32 %v464_v0, %v444_v29 }
 0x32e   :  { %v476_v50 = vadd.f32 %v473_v46, %v467_v47  ;;  %v477_v52 = vadd.f32 %v473_v46, %v468_v48  ;;  %v478_v53 = vadd.f32 %v473_v46, %v469_v49  ;;  %v475_v56 = vadd.f32 %v473_v46, %v466_v51  ;;  %v686_v46 = vld [vmem:[%s1567_s1 + $0xa8] sm:$0xff]  ;;  %v685_v51 = vld [vmem:[%s1567_s1 + $0xa0] sm:$0xff] }
 0x330   :  { %v1309_v54 = vmax.f32 %v476_v50, 0.0  ;;  %v1315_v57 = vmax.f32 %v477_v52, 0.0  ;;  %v1317_v58 = vmax.f32 %v478_v53, 0.0  ;;  %v1323_v59 = vmax.f32 %v475_v56, 0.0  ;;  %v674_v53 = vld [vmem:[%s1567_s1 + $0x88] sm:$0xff] }
 0x332   :  { %579 = vrot.lane.b32.xlu0 %v1309_v54, %s1010_s19  ;;  %611 = vrot.lane.b32.xlu1 %v1309_v54, %s1008_s18 }
 0x336   :  { %615 = vrot.lane.b32.xlu0 %v1317_v58, %s1008_s18  ;;  %613 = vrot.lane.b32.xlu1 %v1315_v57, %s1008_s18 }
 0x33a   :  { %563 = vrot.lane.b32.xlu0 %v1309_v54, %s1009_s2  ;;  %609 = vrot.lane.b32.xlu1 %v1323_v59, %s1008_s18 }
 0x33e   :  { %599 = vrot.lane.b32.xlu0 %v1317_v58, %s1007_s17  ;;  %595 = vrot.lane.b32.xlu1 %v1309_v54, %s1007_s17 }
 0x342   :  { %583 = vrot.lane.b32.xlu0 %v1317_v58, %s1010_s19  ;;  %597 = vrot.lane.b32.xlu1 %v1315_v57, %s1007_s17 }
 0x346   :  { %547 = vrot.lane.b32.xlu0 %v1309_v54, %s1011_s20  ;;  %593 = vrot.lane.b32.xlu1 %v1323_v59, %s1007_s17 }
 0x34a   :  { %529 = vrot.lane.b32.xlu0 %v1323_v59, %s1013_s22  ;;  %581 = vrot.lane.b32.xlu1 %v1315_v57, %s1010_s19 }
 0x34e   :  { %513 = vrot.lane.b32.xlu0 %v1323_v59, %s1012_s21  ;;  %577 = vrot.lane.b32.xlu1 %v1323_v59, %s1010_s19 }
 0x352   :  { %549 = vrot.lane.b32.xlu0 %v1315_v57, %s1011_s20  ;;  %565 = vrot.lane.b32.xlu1 %v1315_v57, %s1009_s2 }
 0x356   :  { %497 = vrot.lane.b32.xlu0 %v1323_v59, %s1014_s23  ;;  %561 = vrot.lane.b32.xlu1 %v1323_v59, %s1009_s2 }
 0x35a   :  { %533 = vrot.lane.b32.xlu0 %v1315_v57, %s1013_s22  ;;  %545 = vrot.lane.b32.xlu1 %v1323_v59, %s1011_s20 }
 0x35e   :  { %517 = vrot.lane.b32.xlu0 %v1315_v57, %s1012_s21  ;;  %567 = vrot.lane.b32.xlu1 %v1317_v58, %s1009_s2 }
 0x362   :  { %501 = vrot.lane.b32.xlu0 %v1315_v57, %s1014_s23  ;;  %531 = vrot.lane.b32.xlu1 %v1309_v54, %s1013_s22 }
 0x366   :  { %515 = vrot.lane.b32.xlu1 %v1309_v54, %s1012_s21 }
 0x36a   :  { %551 = vrot.lane.b32.xlu1 %v1317_v58, %s1011_s20 }
 0x36e   :  { %499 = vrot.lane.b32.xlu1 %v1309_v54, %s1014_s23 }
 0x372   :  { %535 = vrot.lane.b32.xlu1 %v1317_v58, %s1013_s22 }
 0x376   :  { %519 = vrot.lane.b32.xlu1 %v1317_v58, %s1012_s21 }
 0x37a   :  { %503 = vrot.lane.b32.xlu1 %v1317_v58, %s1014_s23 }
 0x3a4   :  { %v580_v62 = vpop.permute.xlu0 %579  ;;  %v612_v63 = vpop.permute.xlu1 %611 }
 0x3a8   :  { %v616_v2 = vpop.permute.xlu0 %615  ;;  %v614_v6 = vpop.permute.xlu1 %613 }
 0x3a9   :  { %v624_v7 = vsel %vm159_vm0, %v616_v2, 0.0  ;;  %v618_v8 = vsel %vm159_vm0, %v612_v63, %v614_v6  ;;  %v619_v9 = vsel %vm159_vm0, %v614_v6, %v616_v2  ;;  %v677_v2 = vmul.f32 %v673_v60, %v1323_v59  ;;  %v639_v60 = vld [vmem:[%s1567_s1 + $0x30] sm:$0xff] }
 0x3aa   :  { %v728_v10 = vmul.f32 %v724_v4, %v624_v7  ;;  %v726_v11 = vmul.f32 %v722_v42, %v618_v8  ;;  %v727_v12 = vmul.f32 %v723_v1, %v619_v9  ;;  %v662_v4 = vld [vmem:[%s1567_s1 + $0x68] sm:$0xff]  ;;  %v678_v42 = vmul.f32 %v674_v53, %v1309_v54  ;;  %v688_v54 = vld [vmem:[%s1567_s1 + $0xb8] sm:$0xff] }
 0x3ac   :  { %859 = vmatprep.subr.mxu1 %v728_v10  ;;  %v564_v61 = vpop.permute.xlu0 %563  ;;  %788 = vmatprep.subr.mxu0 %v726_v11  ;;  %v610_v13 = vpop.permute.xlu1 %609  ;;  %v687_v11 = vld [vmem:[%s1567_s1 + $0xb0] sm:$0xff] }
 0x3ad   :  { %v617_v14 = vsel %vm159_vm0, %v610_v13, %v612_v63  ;;  %860 = vmatpush1.msra.mxu1 %v727_v12  ;;  %v661_v63 = vld [vmem:[%s1567_s1 + $0x60] sm:$0xff] }
 0x3ae   :  { %v725_v16 = vmul.f32 %v721_v55, %v617_v14 }
 0x3b0   :  { %v600_v17 = vpop.permute.xlu0 %599  ;;  %789 = vmatpush1.msra.mxu0 %v725_v16  ;;  %v596_v18 = vpop.permute.xlu1 %595  ;;  %v675_v16 = vld [vmem:[%s1567_s1 + $0x90] sm:$0xff] }
 0x3b1   :  { %v608_v19 = vsel %vm145_vm2, %v600_v17, 0.0 }
 0x3b2   :  { %v716_v20 = vmul.f32 %v712_v5, %v608_v19 }
 0x3b4   :  { %v584_v25 = vpop.permute.xlu0 %583  ;;  %861 = vmatprep.subr.mxu1 %v716_v20  ;;  %v598_v26 = vpop.permute.xlu1 %597 }
 0x3b5   :  { %v592_v27 = vsel %vm128_vm4, %v584_v25, 0.0  ;;  %v602_v28 = vsel %vm145_vm2, %v596_v18, %v598_v26  ;;  %v603_v29 = vsel %vm145_vm2, %v598_v26, %v600_v17  ;;  %v650_v17 = vld [vmem:[%s1567_s1 + $0x48] sm:$0xff] }
 0x3b6   :  { %v704_v30 = vmul.f32 %v700_v22, %v592_v27  ;;  %v714_v21 = vmul.f32 %v710_v23, %v602_v28  ;;  %v715_v31 = vmul.f32 %v711_v24, %v603_v29  ;;  %v679_v24 = vmul.f32 %v675_v16, %v1315_v57  ;;  %v638_v27 = vld [vmem:[%s1567_s1 + $0x28] sm:$0xff]  ;;  %v637_v28 = vld [vmem:[%s1567_s1 + $0x20] sm:$0xff] }
 0x3b8   :  { %790 = vmatprep.subr.mxu0 %v714_v21  ;;  %862 = vmatpush1.msra.mxu1 %v715_v31  ;;  %v594_v32 = vpop.permute.xlu1 %593  ;;  %v1435_v3 = vpop.permute.xlu0 %547 }
 0x3b9   :  { %v601_v33 = vsel %vm145_vm2, %v594_v32, %v596_v18  ;;  %863 = vmatprep.subr.mxu1 %v704_v30  ;;  %v649_v18 = vld [vmem:[%s1567_s1 + $0x40] sm:$0xff]  ;;  %v663_v32 = vld [vmem:[%s1567_s1 + $0x70] sm:$0xff] }
 0x3ba   :  { %v713_v34 = vmul.f32 %v709_v15, %v601_v33  ;;  %v664_v15 = vld [vmem:[%s1567_s1 + $0x78] sm:$0xff] }
 0x3bc   :  { %791 = vmatpush1.msra.mxu0 %v713_v34  ;;  %v582_v37 = vpop.permute.xlu1 %581  ;;  %v530_v50 = vpop.permute.xlu0 %529 }
 0x3bd   :  { %v586_v38 = vsel %vm128_vm4, %v580_v62, %v582_v37  ;;  %v587_v39 = vsel %vm128_vm4, %v582_v37, %v584_v25  ;;  %v544_v19 = vsel %vm83_vm6, 0.0, %v530_v50 }
 0x3be   :  { %v702_v40 = vmul.f32 %v698_v35, %v586_v38  ;;  %v703_v41 = vmul.f32 %v699_v36, %v587_v39  ;;  %v653_v26 = vmul.f32 %v649_v18, %v544_v19  ;;  %v626_v39 = vld [vmem:[%s1567_s1 + $0x8] sm:$0xff] }
 0x3c0   :  { %792 = vmatprep.subr.mxu0 %v702_v40  ;;  %864 = vmatpush1.msra.mxu1 %v703_v41  ;;  %v578_v44 = vpop.permute.xlu1 %577  ;;  %v514_v6 = vpop.permute.xlu0 %513  ;;  %v625_v40 = vld [vmem:[%s1567_s1] sm:$0xff] }
 0x3c1   :  { %v585_v45 = vsel %vm128_vm4, %v578_v44, %v580_v62  ;;  %v528_v29 = vsel %vm69_vm7, 0.0, %v514_v6 }
 0x3c2   :  { %v701_v0 = vmul.f32 %v697_v43, %v585_v45  ;;  %v641_v31 = vmul.f32 %v637_v28, %v528_v29 }
 0x3c4   :  { %793 = vmatpush1.msra.mxu0 %v701_v0  ;;  %v566_v47 = vpop.permute.xlu1 %565  ;;  %v550_v5 = vpop.permute.xlu0 %549  ;;  %v652_v0 = vld [vmem:[%s1567_s1 + $0x58] sm:$0xff] }
 0x3c5   :  { %v570_v48 = vsel %vm114_vm3, %v564_v61, %v566_v47  ;;  %v554_v33 = vsel %vm100_vm5, %v1435_v3, %v550_v5 }
 0x3c6   :  { %v690_v49 = vmul.f32 %v686_v46, %v570_v48  ;;  %v667_v37 = vmul.f32 %v663_v32, %v554_v33  ;;  %v733_v46 = vld [vmem:[%s1568_s6] sm:$0xff] }
 0x3c8   :  { %794 = vmatprep.subr.mxu0 %v690_v49  ;;  %v562_v52 = vpop.permute.xlu1 %561  ;;  %v498_v30 = vpop.permute.xlu0 %497 }
 0x3c9   :  { %v569_v56 = vsel %vm114_vm3, %v562_v52, %v564_v61  ;;  %v676_v61 = vld [vmem:[%s1567_s1 + $0x98] sm:$0xff]  ;;  %v512_v41 = vsel %vm52_vm8, 0.0, %v498_v30 }
 0x3ca   :  { %v689_v62 = vmul.f32 %v685_v51, %v569_v56  ;;  %v680_v22 = vmul.f32 %v676_v61, %v1317_v58  ;;  %v629_v45 = vmul.f32 %v625_v40, %v512_v41  ;;  %v640_v56 = vld [vmem:[%s1567_s1 + $0x38] sm:$0xff]  ;;  %v431_v61 = vpop.f32.mrf.mxu1 }
 0x3cc   :  { %795 = vmatpush1.msra.mxu0 %v689_v62  ;;  %v546_v1 = vpop.permute.xlu1 %545  ;;  %v534_v38 = vpop.permute.xlu0 %533 }
 0x3cd   :  { %v553_v7 = vsel %vm100_vm5, %v546_v1, %v1435_v3  ;;  %v560_v8 = vsel %vm100_vm5, 0.0, %v546_v1  ;;  %796 = vmatprep.subr.mxu0 %v678_v42 }
 0x3ce   :  { %v665_v9 = vmul.f32 %v661_v63, %v560_v8  ;;  %v666_v10 = vmul.f32 %v662_v4, %v553_v7  ;;  %797 = vmatpush1.msra.mxu0 %v677_v2  ;;  %v627_v7 = vld [vmem:[%s1567_s1 + $0x10] sm:$0xff] }
 0x3d0   :  { %v568_v12 = vpop.permute.xlu1 %567  ;;  %798 = vmatprep.subr.mxu0 %v666_v10 }
 0x3d1   :  { %v571_v59 = vsel %vm114_vm3, %v566_v47, %v568_v12  ;;  %v576_v55 = vsel %vm114_vm3, %v568_v12, 0.0  ;;  %799 = vmatpush1.msra.mxu0 %v665_v9  ;;  %v651_v47 = vld [vmem:[%s1567_s1 + $0x50] sm:$0xff]  ;;  %v354_v12 = vpop.f32.mrf.mxu0 }
 0x3d2   :  { %v691_v13 = vmul.f32 %v687_v11, %v571_v59  ;;  %v692_v14 = vmul.f32 %v688_v54, %v576_v55 }
 0x3d3   :  { %v356_v59 = vpop.f32.mrf.mxu0 }
 0x3d4   :  { %865 = vmatprep.subr.mxu1 %v692_v14  ;;  %v532_v20 = vpop.permute.xlu1 %531  ;;  %v433_v14 = vpop.f32.mrf.mxu1 }
 0x3d5   :  { %v537_v23 = vsel %vm83_vm6, %v530_v50, %v532_v20  ;;  %866 = vmatpush1.msra.mxu1 %v691_v13  ;;  %v538_v48 = vsel %vm83_vm6, %v532_v20, %v534_v38  ;;  %v518_v50 = vpop.permute.xlu0 %517 }
 0x3d6   :  { %v654_v25 = vmul.f32 %v650_v17, %v537_v23  ;;  %867 = vmatprep.subr.mxu1 %v680_v22  ;;  %v655_v53 = vmul.f32 %v651_v47, %v538_v48 }
 0x3d7   :  { %868 = vmatpush1.msra.mxu1 %v679_v24 }
 0x3d8   :  { %v516_v58 = vpop.permute.xlu1 %515  ;;  %800 = vmatprep.subr.mxu0 %v654_v25 }
 0x3d9   :  { %v521_v21 = vsel %vm69_vm7, %v514_v6, %v516_v58  ;;  %801 = vmatpush1.msra.mxu0 %v653_v26  ;;  %v522_v62 = vsel %vm69_vm7, %v516_v58, %v518_v50  ;;  %v502_v1 = vpop.permute.xlu0 %501  ;;  %v628_v6 = vld [vmem:[%s1567_s1 + $0x18] sm:$0xff] }
 0x3da   :  { %v642_v57 = vmul.f32 %v638_v27, %v521_v21  ;;  %v643_v2 = vmul.f32 %v639_v60, %v522_v62 }
 0x3dc   :  { %v552_v34 = vpop.permute.xlu1 %551  ;;  %802 = vmatprep.subr.mxu0 %v642_v57 }
 0x3dd   :  { %v555_v35 = vsel %vm100_vm5, %v550_v5, %v552_v34  ;;  %803 = vmatpush1.msra.mxu0 %v641_v31  ;;  %v483_v31 = vld [vmem:[%s1569_s9] sm:$0xff] }
 0x3de   :  { %v668_v36 = vmul.f32 %v664_v15, %v555_v35  ;;  %v916_v34 = vld [vmem:[%s1570_s7] sm:$0xff] }
 0x3e0   :  { %869 = vmatprep.subr.mxu1 %v668_v36  ;;  %v500_v43 = vpop.permute.xlu1 %499 }
 0x3e1   :  { %v505_v44 = vsel %vm52_vm8, %v498_v30, %v500_v43  ;;  %870 = vmatpush1.msra.mxu1 %v667_v37  ;;  %v506_v8 = vsel %vm52_vm8, %v500_v43, %v502_v1  ;;  %v917_v37 = vld [vmem:[%s1571_s8] sm:$0xff] }
 0x3e2   :  { %v630_v3 = vmul.f32 %v626_v39, %v505_v44  ;;  %v631_v54 = vmul.f32 %v627_v7, %v506_v8 }
 0x3e4   :  { %v536_v49 = vpop.permute.xlu1 %535  ;;  %804 = vmatprep.subr.mxu0 %v630_v3 }
 0x3e5   :  { %v539_v51 = vsel %vm83_vm6, %v534_v38, %v536_v49  ;;  %805 = vmatpush1.msra.mxu0 %v629_v45 }
 0x3e6   :  { %v656_v52 = vmul.f32 %v652_v0, %v539_v51  ;;  %985 = vmatmul.mubr.msk.f32.vlgmr.msra.gmra.mxu0 %vm770_vm10, %v733_v46 }
 0x3e8   :  { %871 = vmatprep.subr.mxu1 %v656_v52  ;;  %v520_v63 = vpop.permute.xlu1 %519 }
 0x3e9   :  { %v523_v4 = vsel %vm69_vm7, %v518_v50, %v520_v63  ;;  %872 = vmatpush1.msra.mxu1 %v655_v53 }
 0x3ea   :  { %v644_v42 = vmul.f32 %v640_v56, %v523_v4 }
 0x3ec   :  { %873 = vmatprep.subr.mxu1 %v644_v42  ;;  %v504_v9 = vpop.permute.xlu1 %503 }
 0x3ed   :  { %v507_v10 = vsel %vm52_vm8, %v502_v1, %v504_v9  ;;  %874 = vmatpush1.msra.mxu1 %v643_v2 }
 0x3ee   :  { %v632_v11 = vmul.f32 %v628_v6, %v507_v10 }
 0x3f0   :  { %875 = vmatprep.subr.mxu1 %v632_v11 }
 0x3f1   :  { %876 = vmatpush1.msra.mxu1 %v631_v54 }
 0x3f2   :  { %986 = vmatmul.mubr.msk.f32.vlgmr.msra.gmra.mxu1 %vm770_vm10, %v733_v46 }
 0x4a6   :  { %v840_v55 = vpop.f32.mrf.mxu0 }
 0x4a8   :  { %v842_v13 = vpop.f32.mrf.mxu0 }
 0x4a9   :  { %v918_v16 = vadd.f32 %v842_v13, %v840_v55 }
 0x4b2   :  { %v911_v5 = vpop.f32.mrf.mxu1 }
 0x4b3   :  { %v919_v17 = vadd.f32 %v918_v16, %v911_v5 }
 0x4b4   :  { %v913_v18 = vpop.f32.mrf.mxu1 }
 0x4b5   :  { %v920_v19 = vadd.f32 %v919_v17, %v913_v18 }
 0x4b7   :  { %921 = vadd.xlane.f32.xlu0 %v920_v19 }
 0x540   :  { %v922_v20 = vpop.xlane.xlu0 %921 }
 0x541   :  { %v923_v22 = vmul.f32 0.001953125, %v922_v20 }
 0x543   :  { %v924_v23 = vsub.f32 %v840_v55, %v923_v22  ;;  %v925_v24 = vsub.f32 %v842_v13, %v923_v22  ;;  %v926_v25 = vsub.f32 %v911_v5, %v923_v22  ;;  %v927_v26 = vsub.f32 %v913_v18, %v923_v22 }
 0x545   :  { %v928_v27 = vmul.f32 %v924_v23, %v924_v23  ;;  %v929_v28 = vmul.f32 %v925_v24, %v925_v24  ;;  %v930_v29 = vmul.f32 %v926_v25, %v926_v25  ;;  %v931_v30 = vmul.f32 %v927_v26, %v927_v26 }
 0x547   :  { %v932_v58 = vadd.f32 %v929_v28, %v928_v27 }
 0x549   :  { %v933_v21 = vadd.f32 %v932_v58, %v930_v29 }
 0x54b   :  { %v934_v57 = vadd.f32 %v933_v21, %v931_v30 }
 0x54d   :  { %935 = vadd.xlane.f32.xlu1 %v934_v57 }
 0x55e   :  { %486 = vperm.xlu1 %1000, %v483_v31  }
 0x5d6   :  { %v936_v15 = vpop.xlane.xlu1 %935 }
 0x5d7   :  { %v937_v32 = vmul.f32 0.001953125, %v936_v15 }
 0x5d9   :  { %v938_v33 = vadd.f32 1e-05, %v937_v32 }
 0x5da   :  { %v487_v39 = vpop.permute.xlu1 %486 }
 0x5db   :  { %1005 = vrsqrt.f32 %v938_v33  ;;  %v489_v3 = vadd.f32 %v487_v39, %v354_v12  ;;  %v490_v45 = vadd.f32 %v487_v39, %v356_v59  ;;  %v491_v0 = vadd.f32 %v487_v39, %v431_v61 }
 0x5dc   :  { %v492_v46 = vadd.f32 %v487_v39, %v433_v14 }
 0x5e8   :  { %v1006_v35 = vpop.eup %1005 }
 0x5e9   :  { %v940_v36 = vmul.f32 %v1006_v35, %v916_v34 }
 0x5eb   :  { %943 = vperm.xlu0 %999, %v940_v36  }
 0x5ef   :  { %952 = vperm.xlu0 %999, %v917_v37  }
 0x666   :  { %v944_v38 = vpop.permute.xlu0 %943 }
 0x667   :  { %v946_v40 = vmul.f32 %v944_v38, %v924_v23  ;;  %v947_v41 = vmul.f32 %v944_v38, %v925_v24  ;;  %v948_v43 = vmul.f32 %v944_v38, %v926_v25  ;;  %v949_v44 = vmul.f32 %v944_v38, %v927_v26 }
 0x66a   :  { %v953_v47 = vpop.permute.xlu0 %952 }
 0x66b   :  { %v955_v48 = vadd.f32 %v953_v47, %v946_v40  ;;  %v956_v49 = vadd.f32 %v953_v47, %v947_v41  ;;  %v957_v50 = vadd.f32 %v953_v47, %v948_v43  ;;  %v958_v51 = vadd.f32 %v953_v47, %v949_v44 }
 0x66d   :  { %v959_v52 = vadd.f32 %v955_v48, %v489_v3  ;;  %v960_v53 = vadd.f32 %v956_v49, %v490_v45  ;;  %v961_v56 = vadd.f32 %v957_v50, %v491_v0  ;;  %v962_v60 = vadd.f32 %v958_v51, %v492_v46 }
 0x66f   :  { %v963_v62 = vmax.f32 %v959_v52, 0.0  ;;  %v964_v63 = vmax.f32 %v960_v53, 0.0  ;;  %v965_v4 = vmax.f32 %v961_v56, 0.0  ;;  %v966_v42 = vmax.f32 %v962_v60, 0.0 }
 0x671   :  { %967 = vst [vmem:[%s1572_s10] sm:$0xff] %v963_v62  ;;  %968 = vst [vmem:[%s1572_s10 + $0x8] sm:$0xff] %v964_v63 }
 0x672   :  { %987 = vst [vmem:[%s1572_s10 + $0x10] sm:$0xff] %v965_v4  ;;  %988 = vst [vmem:[%s1572_s10 + $0x18] sm:$0xff] %v966_v42 }

</bundles_post_ra>
